<compile_context>
chip_gen: v7x
topology: tpu7x:2x2x1
jax: 0.10.0
libtpu: 0.0.40
codegen_flags: <defaults>
</compile_context>

<pallas_src>
import functools

import jax
import jax.numpy as jnp
from jax.experimental import pallas as pl
from jax.experimental.pallas import tpu as pltpu


def _cblock_kernel(x2_ref, w1_ref, w2_ref, m_ref, convb_ref, out_ref,
                   *, inv_hw, inv_c):
    x2 = x2_ref[...]                                          # (C, H*W)

    # ---- ChannelAttention: global max / avg pool (lane reductions) ----
    cmax = jnp.max(x2, axis=1, keepdims=True)                 # (C, 1)
    cavg = jnp.sum(x2, axis=1, keepdims=True) * inv_hw        # (C, 1)
    v = jnp.concatenate([cmax, cavg], axis=1)                 # (C, 2)

    # Shared SE MLP (two bias-free 1x1 convs == matmuls) on both pooled vecs.
    h = jnp.maximum(
        jnp.dot(w1_ref[...], v, preferred_element_type=jnp.float32), 0.0)  # (Cr, 2)
    o = jnp.dot(w2_ref[...], h, preferred_element_type=jnp.float32)        # (C, 2)
    channel_map = jax.nn.sigmoid(o[:, 0:1] + o[:, 1:2])                    # (C, 1)

    # ---- SpatialAttention: channel max / mean (sublane reductions over C) ----
    smax = jnp.max(x2, axis=0, keepdims=True)                 # (1, H*W)
    savg = jnp.sum(x2, axis=0, keepdims=True) * inv_c         # (1, H*W)
    pooled = jnp.concatenate([smax, savg], axis=1)            # (1, 2*H*W)

    # Padding + im2col folded into m_ref: the full KxK conv over both pooled
    # maps is a single MXU matmul producing the lane-dense spatial row.
    conv = jnp.dot(pooled, m_ref[...],
                   preferred_element_type=jnp.float32)        # (1, Nout_pad)
    smap = jax.nn.sigmoid(conv + convb_ref[0])                # (1, Nout_pad)

    # ---- att = channel_map * spatial_map, lane-dense (C, Nout_pad) store ----
    out_ref[...] = channel_map * smap


def cblock_forward(x, w1, w2, conv_w, conv_b, *, kernel_size):
    """x: (C, H, W) f32.  w1: (C//r, C), w2: (C, C//r), conv_w: (1, 2, K, K),
    conv_b: (1,) with K = kernel_size + 1.  Returns (C, Hout, Wout)."""
    C, H, W = x.shape
    K = kernel_size + 1
    pad = kernel_size // 2
    Hout = H + 2 * pad - K + 1
    Wout = W + 2 * pad - K + 1
    HW = H * W
    Nout = Hout * Wout
    Nout_pad = ((Nout + 127) // 128) * 128

    x2 = x.reshape(C, HW).astype(jnp.float32)                 # lane-dense view

    # Precompute the padded-im2col weight matrix
    #   M[(c, h, w), (oi, oj)] = conv_w[0, c, h + pad - oi, w + pad - oj]
    # (zero outside the kernel window; zeros encode the conv zero-padding).
    cw = conv_w[0].astype(jnp.float32)                        # (2, K, K)
    kh = jnp.arange(H)[:, None] + pad - jnp.arange(Hout)[None, :]   # (H, Hout)
    kw = jnp.arange(W)[:, None] + pad - jnp.arange(Wout)[None, :]   # (W, Wout)
    vh = (kh >= 0) & (kh < K)
    vw = (kw >= 0) & (kw < K)
    kh_c = jnp.clip(kh, 0, K - 1)
    kw_c = jnp.clip(kw, 0, K - 1)
    idx_h = kh_c[:, None, :, None]                            # (H, 1, Hout, 1)
    idx_w = kw_c[None, :, None, :]                            # (1, W, 1, Wout)
    M = cw[:, idx_h, idx_w]                                   # (2, H, W, Hout, Wout)
    valid = (vh[:, None, :, None] & vw[None, :, None, :])[None]
    M = jnp.where(valid, M, 0.0).reshape(2 * HW, Nout)
    M = jnp.pad(M, ((0, 0), (0, Nout_pad - Nout))).astype(jnp.float32)

    kern = functools.partial(_cblock_kernel, inv_hw=1.0 / HW, inv_c=1.0 / C)
    out2d = pl.pallas_call(
        kern,
        out_shape=jax.ShapeDtypeStruct((C, Nout_pad), jnp.float32),
        in_specs=[
            pl.BlockSpec(memory_space=pltpu.MemorySpace.VMEM),   # x2   (C, H*W)
            pl.BlockSpec(memory_space=pltpu.MemorySpace.VMEM),   # w1
            pl.BlockSpec(memory_space=pltpu.MemorySpace.VMEM),   # w2
            pl.BlockSpec(memory_space=pltpu.MemorySpace.VMEM),   # im2col conv W
            pl.BlockSpec(memory_space=pltpu.MemorySpace.SMEM),   # conv bias
        ],
        out_specs=pl.BlockSpec(memory_space=pltpu.MemorySpace.VMEM),
    )(x2, w1.astype(jnp.float32), w2.astype(jnp.float32), M,
      conv_b.astype(jnp.float32))
    return out2d[:, :Nout].reshape(C, Hout, Wout)


def ref_cblock(x, w1, w2, conv_w, conv_b, *, kernel_size):
    """Pure-JAX reference matching the PyTorch forward."""
    pad = kernel_size // 2

    cmax = jnp.max(x, axis=(1, 2))
    cavg = jnp.mean(x, axis=(1, 2))

    def se(v):
        return w2 @ jnp.maximum(w1 @ v, 0.0)

    cmap = jax.nn.sigmoid(se(cmax) + se(cavg))              # (C,)

    smax = jnp.max(x, axis=0)
    savg = jnp.mean(x, axis=0)
    maps = jnp.stack([smax, savg], axis=0)[None]            # (1, 2, H, W)
    conv = jax.lax.conv_general_dilated(
        maps, conv_w, window_strides=(1, 1),
        padding=((pad, pad), (pad, pad)))                   # (1, 1, Hout, Wout)
    smap = jax.nn.sigmoid(conv[0, 0] + conv_b[0])
    return cmap[:, None, None] * smap[None, :, :]


if __name__ == "__main__":
    channel, reduction, kernel_size = 32, 4, 7
    H = W = 16
    C_r = channel // reduction
    K = kernel_size + 1

    key = jax.random.PRNGKey(0)
    k_x, k_w1, k_w2, k_cw = jax.random.split(key, 4)

    x = jax.random.normal(k_x, (channel, H, W), jnp.float32)
    # Deterministic synthetic init (kaiming-like scale); not a checkpoint load.
    w1 = jax.random.normal(k_w1, (C_r, channel), jnp.float32) * (2.0 / channel) ** 0.5
    w2 = jax.random.normal(k_w2, (channel, C_r), jnp.float32) * (2.0 / C_r) ** 0.5
    conv_w = jax.random.normal(k_cw, (1, 2, K, K), jnp.float32) * (2.0 / (2 * K * K)) ** 0.5
    conv_b = jnp.zeros((1,), jnp.float32)

    out = cblock_forward(x, w1, w2, conv_w, conv_b, kernel_size=kernel_size)
    out = jax.block_until_ready(out)

    ref = ref_cblock(x, w1, w2, conv_w, conv_b, kernel_size=kernel_size)
    assert out.shape == (channel, H - 1, W - 1), out.shape
    if not jnp.allclose(out, ref, atol=2e-4, rtol=2e-4):
        raise AssertionError("Pallas output does not match JAX reference")

    print("KERNEL_OK")
</pallas_src>

<mosaic_0001>
module attributes {stable_mosaic.version = 11 : i64} {
  func.func @_cblock_kernel(%arg0: memref<32x256xf32, #tpu.memory_space<vmem>>, %arg1: memref<8x32xf32, #tpu.memory_space<vmem>>, %arg2: memref<32x8xf32, #tpu.memory_space<vmem>>, %arg3: memref<512x256xf32, #tpu.memory_space<vmem>>, %arg4: memref<1xf32, #tpu.memory_space<smem>>, %arg5: memref<32x256xf32, #tpu.memory_space<vmem>>) attributes {dimension_semantics = [], scalar_prefetch = 0 : i64, scratch_operands = 0 : i64, tpu.core_type = #tpu.core_type<tc>} {
    %c0 = arith.constant 0 : index
    %c0_0 = arith.constant 0 : index
    %0 = vector.load %arg0[%c0, %c0_0] : memref<32x256xf32, #tpu.memory_space<vmem>>, vector<32x256xf32>
    %cst = arith.constant dense<0xFF800000> : vector<32xf32>
    %1 = vector.multi_reduction <maximumf>, %0, %cst [1] : vector<32x256xf32> to vector<32xf32>
    %2 = vector.shape_cast %1 : vector<32xf32> to vector<32x1xf32>
    %cst_1 = arith.constant dense<0.000000e+00> : vector<32xf32>
    %3 = vector.multi_reduction <add>, %0, %cst_1 [1] : vector<32x256xf32> to vector<32xf32>
    %4 = vector.shape_cast %3 : vector<32xf32> to vector<32x1xf32>
    %cst_2 = arith.constant 3.906250e-03 : f32
    %5 = vector.broadcast %cst_2 : f32 to vector<32x1xf32>
    %6 = arith.mulf %4, %5 : vector<32x1xf32>
    %7 = tpu.concatenate %2, %6 in 1 : vector<32x1xf32>, vector<32x1xf32> -> vector<32x2xf32>
    %c0_3 = arith.constant 0 : index
    %c0_4 = arith.constant 0 : index
    %8 = vector.load %arg1[%c0_3, %c0_4] : memref<8x32xf32, #tpu.memory_space<vmem>>, vector<8x32xf32>
    %cst_5 = arith.constant dense<0.000000e+00> : vector<8x2xf32>
    %9 = tpu.matmul %8, %7, %cst_5 {dimension_numbers = #tpu.dot_dimension_numbers<[1], [0], [0], [1], [0, 0, 1, 1], [], []>} : vector<8x32xf32>, vector<32x2xf32>, vector<8x2xf32> -> vector<8x2xf32>
    %cst_6 = arith.constant 0.000000e+00 : f32
    %10 = vector.broadcast %cst_6 : f32 to vector<8x2xf32>
    %11 = arith.maximumf %9, %10 : vector<8x2xf32>
    %c0_7 = arith.constant 0 : index
    %c0_8 = arith.constant 0 : index
    %12 = vector.load %arg2[%c0_7, %c0_8] : memref<32x8xf32, #tpu.memory_space<vmem>>, vector<32x8xf32>
    %cst_9 = arith.constant dense<0.000000e+00> : vector<32x2xf32>
    %13 = tpu.matmul %12, %11, %cst_9 {dimension_numbers = #tpu.dot_dimension_numbers<[1], [0], [0], [1], [0, 0, 1, 1], [], []>} : vector<32x8xf32>, vector<8x2xf32>, vector<32x2xf32> -> vector<32x2xf32>
    %14 = vector.extract_strided_slice %13 {offsets = [0, 0], sizes = [32, 1], strides = [1, 1]} : vector<32x2xf32> to vector<32x1xf32>
    %15 = vector.extract_strided_slice %13 {offsets = [0, 1], sizes = [32, 1], strides = [1, 1]} : vector<32x2xf32> to vector<32x1xf32>
    %16 = arith.addf %14, %15 : vector<32x1xf32>
    %17 = arith.negf %16 : vector<32x1xf32>
    %18 = math.exp %17 : vector<32x1xf32>
    %cst_10 = arith.constant 1.000000e+00 : f32
    %19 = vector.broadcast %cst_10 : f32 to vector<32x1xf32>
    %20 = arith.addf %19, %18 : vector<32x1xf32>
    %21 = arith.divf %19, %20 : vector<32x1xf32>
    %cst_11 = arith.constant dense<0xFF800000> : vector<256xf32>
    %22 = vector.multi_reduction <maximumf>, %0, %cst_11 [0] : vector<32x256xf32> to vector<256xf32>
    %23 = vector.shape_cast %22 : vector<256xf32> to vector<1x256xf32>
    %cst_12 = arith.constant dense<0.000000e+00> : vector<256xf32>
    %24 = vector.multi_reduction <add>, %0, %cst_12 [0] : vector<32x256xf32> to vector<256xf32>
    %25 = vector.shape_cast %24 : vector<256xf32> to vector<1x256xf32>
    %cst_13 = arith.constant 3.125000e-02 : f32
    %26 = vector.broadcast %cst_13 : f32 to vector<1x256xf32>
    %27 = arith.mulf %25, %26 : vector<1x256xf32>
    %28 = tpu.concatenate %23, %27 in 1 : vector<1x256xf32>, vector<1x256xf32> -> vector<1x512xf32>
    %c0_14 = arith.constant 0 : index
    %c0_15 = arith.constant 0 : index
    %29 = vector.load %arg3[%c0_14, %c0_15] : memref<512x256xf32, #tpu.memory_space<vmem>>, vector<512x256xf32>
    %cst_16 = arith.constant dense<0.000000e+00> : vector<1x256xf32>
    %30 = tpu.matmul %28, %29, %cst_16 {dimension_numbers = #tpu.dot_dimension_numbers<[1], [0], [0], [1], [0, 0, 1, 1], [], []>} : vector<1x512xf32>, vector<512x256xf32>, vector<1x256xf32> -> vector<1x256xf32>
    %c0_17 = arith.constant 0 : index
    %31 = memref.load %arg4[%c0_17] : memref<1xf32, #tpu.memory_space<smem>>
    %32 = vector.broadcast %31 : f32 to vector<1x256xf32>
    %33 = arith.addf %30, %32 : vector<1x256xf32>
    %34 = arith.negf %33 : vector<1x256xf32>
    %35 = math.exp %34 : vector<1x256xf32>
    %cst_18 = arith.constant 1.000000e+00 : f32
    %36 = vector.broadcast %cst_18 : f32 to vector<1x256xf32>
    %37 = arith.addf %36, %35 : vector<1x256xf32>
    %38 = arith.divf %36, %37 : vector<1x256xf32>
    %39 = vector.broadcast %21 : vector<32x1xf32> to vector<32x256xf32>
    %40 = vector.broadcast %38 : vector<1x256xf32> to vector<32x256xf32>
    %41 = arith.mulf %39, %40 : vector<32x256xf32>
    %c0_19 = arith.constant 0 : index
    %c0_20 = arith.constant 0 : index
    %42 = vector.load %arg5[%c0_19, %c0_20] : memref<32x256xf32, #tpu.memory_space<vmem>>, vector<32x256xf32>
    tpu.vector_store %arg5[%c0_19, %c0_20], %41 {strides = array<i32>} : memref<32x256xf32, #tpu.memory_space<vmem>>, vector<32x256xf32>,
    return
  }
}

</mosaic_0001>

<bundles_post_ra>
// kernel: tpu_custom_call.1
= control target key start
LH: loop header
LB: loop body
LE: loop exit
PB: predicated region body
PF: predicated region fallthrough
CT: control target
= control target key end

     0   :  { %11 = vsyncpa [#allocation4], 0  ;;  %s1136_s0 = inlined_call_operand.hbm [shape: f32[32,256], index: 0, kind: input, shape index: {}]   ;;  %s1137_s1 = inlined_call_operand.vmem [shape: f32[8,32], index: 1, kind: input, shape index: {}]   ;;  %s1138_s2 = inlined_call_operand.vmem [shape: f32[32,8], index: 2, kind: input, shape index: {}]   ;;  %s1139_s3 = inlined_call_operand.hbm [shape: f32[512,256], index: 3, kind: input, shape index: {}]   ;;  %s1140_s4 = inlined_call_operand.<no memory space> [shape: f32[1], index: 4, kind: input, shape index: {}]   ;;  %s1141_s5 = inlined_call_operand.hbm [shape: f32[32,256], index: 5, kind: output, shape index: {}]  }
   0x1   :  { %12 = vsyncpa [#allocation7], 0 }
   0x2   :  { %13 = vsyncpa [#allocation5], 0  ;;  %s983_s18 = smov [#allocation3]   ;;  %s911_s22 = scalar_lea.hbm %s1136_s0, 1024 }
   0x3   :  { %s19_s19 = sshll.u32 %s983_s18, 4  ;;  %p912_p0 = scmp.ne.s32.totalorder %s1136_s0, %s911_s22  ;;  %s20_s19 = int_to_ptr.vmem [resolvable:$true] %s19_s19 }
   0x4   :  { %p915_p1 = scmp.lt.u32.totalorder %s911_s22, %s1136_s0 }
   0x6   :  { %p917_p2 = pnand %p915_p1, %p912_p0 }
   0x8   :  { %920 = shalt.err (!%p917_p2)
}
   0x9   :  { %s921_s27 = scalar_lea.vmem %s20_s19, 1024  ;;  %p926_p4 = scmp.lt.s32.totalorder %s20_s19, %s20_s19 }
   0xa   :  { %p922_p3 = scmp.ne.s32.totalorder %s20_s19, %s921_s27  ;;  %p927_p5 = scmp.lt.s32.totalorder %s921_s27, %s921_s27 }
   0xc   :  { %p928_p6 = por %p927_p5, %p926_p4 }
   0xe   :  { %p929_p7 = pnand %p928_p6, %p922_p3 }
  0x10   :  { %932 = shalt.err (!%p929_p7)
}
  0x11   :  { %s984_s28 = smov 256   ;;  %s985_s29 = smov 16  }
  0x12   :  { %25 = dma.hbm_to_vmem [thread:$0]  %s1136_s0, 1024, %s20_s19, [#allocation4], %s984_s28, %s984_s28, %s985_s29  }
  0x13   :  { %s986_s7 = smov [#allocation6]   ;;  %s933_s11 = scalar_lea.hbm %s1139_s3, 16384 }
  0x14   :  { %s35_s8 = sshll.u32 %s986_s7, 4  ;;  %p934_p8 = scmp.ne.s32.totalorder %s1139_s3, %s933_s11  ;;  %s36_s8 = int_to_ptr.vmem [resolvable:$true] %s35_s8 }
  0x15   :  { %p937_p9 = scmp.lt.u32.totalorder %s933_s11, %s1139_s3 }
  0x17   :  { %p939_p10 = pnand %p937_p9, %p934_p8 }
  0x19   :  { %942 = shalt.err (!%p939_p10)
}
  0x1a   :  { %s943_s16 = scalar_lea.vmem %s36_s8, 16384  ;;  %p948_p12 = scmp.lt.s32.totalorder %s36_s8, %s36_s8 }
  0x1b   :  { %p944_p11 = scmp.ne.s32.totalorder %s36_s8, %s943_s16  ;;  %p949_p13 = scmp.lt.s32.totalorder %s943_s16, %s943_s16 }
  0x1d   :  { %p950_p0 = por %p949_p13, %p948_p12 }
  0x1f   :  { %p951_p1 = pnand %p950_p0, %p944_p11 }
  0x21   :  { %954 = shalt.err (!%p951_p1)
}
  0x22   :  { %41 = dma.hbm_to_vmem [thread:$0]  %s1139_s3, 16384, %s36_s8, [#allocation7], %s984_s28, %s984_s28, %s985_s29  }
  0x23   :  { %977 = dma.done.wait [#allocation4], 1024  }
  0x24   :  { %978 = vsyncadd [#allocation4], 4294966272 }
  0x25   :  { %979 = dma.done.wait [#allocation7], 16384  }
  0x26   :  { %980 = vsyncadd [#allocation7], 4294950912  ;;  %v50_v0 = vld [vmem:[#allocation3] sm:$0xff]  ;;  %v1053_v1 = vld [vmem:[#allocation3 + $0x8] sm:$0xff]  ;;  %v987_v27 = vmov 0.0|0.0   ;;  %vm988_vm0 = vmmov 0  }
  0x27   :  { %v52_v2 = vld [vmem:[#allocation3 + $0x10] sm:$0xff]  ;;  %v70_v3 = vadd.f32 %v1053_v1, %v50_v0  ;;  %v58_v4 = vmax.f32 %v50_v0, %v1053_v1  ;;  %v1057_v5 = vld [vmem:[#allocation3 + $0x18] sm:$0xff]  ;;  %v54_v10 = vld [vmem:[#allocation3 + $0x20] sm:$0xff]  ;;  %737 = vmatprep.subr.bf16.mxu0 %v987_v27  ;;  %v989_v28 = vmov 0.0   ;;  %vm86_vm1 = vcmask 7168  }
  0x28   :  { %v331_v6 = vadd.f32 %v52_v2, %v50_v0  ;;  %v73_v7 = vadd.f32 %v1057_v5, %v52_v2  ;;  %v340_v8 = vadd.f32 %v1057_v5, %v1053_v1  ;;  %v61_v9 = vmax.f32 %v52_v2, %v1057_v5  ;;  %v1063_v11 = vld [vmem:[#allocation3 + $0x28] sm:$0xff]  ;;  %v56_v15 = vld [vmem:[#allocation3 + $0x30] sm:$0xff]  ;;  %v1067_v16 = vld [vmem:[#allocation3 + $0x38] sm:$0xff]  ;;  %726 = vmatprep.mubr.msk.f32.mxu0 %vm988_vm0, %v989_v28 }
  0x29   :  { %71 = vadd.xlane.f32.xlu0 %v70_v3  ;;  %59 = vmax.xlane.f32.xlu1 %v58_v4  ;;  %v313_v12 = vmax.f32 %v50_v0, %v54_v10  ;;  %v322_v13 = vmax.f32 %v1053_v1, %v1063_v11  ;;  %v314_v18 = vmax.f32 %v52_v2, %v56_v15  ;;  %v91_v47 = vld [vmem:[%s1137_s1] sm:$0xff]  ;;  %vm92_vm2 = vcmask 261120   ;;  %v352_v49 = vld [vmem:[#allocation6 + $0x8] sm:$0xff]  ;;  %v354_v50 = vld [vmem:[#allocation6 + $0x18] sm:$0xff] }
  0x2a   :  { %v332_v14 = vadd.f32 %v331_v6, %v54_v10  ;;  %v341_v17 = vadd.f32 %v340_v8, %v1063_v11  ;;  %v323_v19 = vmax.f32 %v1057_v5, %v1067_v16  ;;  %v76_v23 = vadd.f32 %v1063_v11, %v54_v10  ;;  %v167_v48 = vld [vmem:[%s1138_s2] sm:$0xff]  ;;  %v353_v53 = vld [vmem:[#allocation6 + $0x10] sm:$0xff]  ;;  %v356_v55 = vld [vmem:[#allocation6 + $0x28] sm:$0xff] }
  0x2b   :  { %v1074_v21 = vmax.f32 %v313_v12, %v314_v18  ;;  %v79_v24 = vadd.f32 %v1067_v16, %v56_v15  ;;  %v64_v25 = vmax.f32 %v54_v10, %v1063_v11  ;;  %v67_v26 = vmax.f32 %v56_v15, %v1067_v16  ;;  %v351_v51 = vld [vmem:[#allocation6] sm:$0xff]  ;;  %v358_v56 = vld [vmem:[#allocation6 + $0x38] sm:$0xff]  ;;  %v357_v58 = vld [vmem:[#allocation6 + $0x30] sm:$0xff] }
  0x2c   :  { %v1072_v20 = vadd.f32 %v332_v14, %v56_v15  ;;  %v1077_v22 = vadd.f32 %v341_v17, %v1067_v16  ;;  %vm171_vm3 = vcmask 64512   ;;  %v743_v52 = vpack.c.bf16 %v354_v50, %v352_v49  ;;  %v355_v57 = vld [vmem:[#allocation6 + $0x20] sm:$0xff]  ;;  %v360_v61 = vld [vmem:[#allocation6 + $0x48] sm:$0xff]  ;;  %v362_v62 = vld [vmem:[#allocation6 + $0x58] sm:$0xff] }
  0x2d   :  { %74 = vadd.xlane.f32.xlu0 %v73_v7  ;;  %62 = vmax.xlane.f32.xlu1 %v61_v9  ;;  %v745_v54 = vpack.c.bf16 %v353_v53, %v351_v51  ;;  %v747_v59 = vpack.c.bf16 %v358_v56, %v356_v55  ;;  %v749_v60 = vpack.c.bf16 %v357_v58, %v355_v57  ;;  %v359_v0 = vld [vmem:[#allocation6 + $0x40] sm:$0xff]  ;;  %v361_v2 = vld [vmem:[#allocation6 + $0x50] sm:$0xff]  ;;  %v364_v4 = vld [vmem:[#allocation6 + $0x68] sm:$0xff] }
  0x2e   :  { %731 = vmatprep.mubr.msk.f32.mxu1 %vm171_vm3, %v167_v48  ;;  %v751_v63 = vpack.c.bf16 %v362_v62, %v360_v61  ;;  %v753_v3 = vpack.c.bf16 %v361_v2, %v359_v0  ;;  %v366_v6 = vld [vmem:[#allocation6 + $0x78] sm:$0xff]  ;;  %v363_v8 = vld [vmem:[#allocation6 + $0x60] sm:$0xff]  ;;  %v365_v9 = vld [vmem:[#allocation6 + $0x70] sm:$0xff] }
  0x2f   :  { %v755_v7 = vpack.c.bf16 %v366_v6, %v364_v4  ;;  %v368_v10 = vld [vmem:[#allocation6 + $0x88] sm:$0xff]  ;;  %v370_v12 = vld [vmem:[#allocation6 + $0x98] sm:$0xff]  ;;  %v757_v14 = vpack.c.bf16 %v365_v9, %v363_v8  ;;  %v367_v17 = vld [vmem:[#allocation6 + $0x80] sm:$0xff] }
  0x30   :  { %v759_v15 = vpack.c.bf16 %v370_v12, %v368_v10  ;;  %v369_v18 = vld [vmem:[#allocation6 + $0x90] sm:$0xff]  ;;  %v390_v48 = vld [vmem:[#allocation6 + $0x138] sm:$0xff]  ;;  %v416_v51 = vld [vmem:[#allocation6 + $0x208] sm:$0xff] }
  0x31   :  { %77 = vadd.xlane.f32.xlu0 %v76_v23  ;;  %80 = vadd.xlane.f32.xlu1 %v79_v24  ;;  %v372_v23 = vld [vmem:[#allocation6 + $0xa8] sm:$0xff]  ;;  %v374_v24 = vld [vmem:[#allocation6 + $0xb8] sm:$0xff]  ;;  %v373_v28 = vld [vmem:[#allocation6 + $0xb0] sm:$0xff] }
  0x32   :  { %v415_v53 = vld [vmem:[#allocation6 + $0x200] sm:$0xff]  ;;  %v420_v56 = vld [vmem:[#allocation6 + $0x228] sm:$0xff]  ;;  %v422_v57 = vld [vmem:[#allocation6 + $0x238] sm:$0xff] }
  0x33   :  { %v168_v61 = vld [vmem:[%s1138_s2 + $0x8] sm:$0xff]  ;;  %v811_v0 = vpack.c.bf16 %v422_v57, %v420_v56  ;;  %v419_v2 = vld [vmem:[#allocation6 + $0x220] sm:$0xff]  ;;  %v426_v6 = vld [vmem:[#allocation6 + $0x258] sm:$0xff] }
  0x34   :  { %v424_v4 = vld [vmem:[#allocation6 + $0x248] sm:$0xff]  ;;  %v423_v10 = vld [vmem:[#allocation6 + $0x240] sm:$0xff]  ;;  %v425_v12 = vld [vmem:[#allocation6 + $0x250] sm:$0xff] }
  0x35   :  { %65 = vmax.xlane.f32.xlu0 %v64_v25  ;;  %68 = vmax.xlane.f32.xlu1 %v67_v26  ;;  %v761_v25 = vpack.c.bf16 %v369_v18, %v367_v17  ;;  %v763_v26 = vpack.c.bf16 %v374_v24, %v372_v23  ;;  %v815_v9 = vpack.c.bf16 %v426_v6, %v424_v4  ;;  %v427_v23 = vld [vmem:[#allocation6 + $0x260] sm:$0xff]  ;;  %v429_v24 = vld [vmem:[#allocation6 + $0x270] sm:$0xff]  ;;  %v334_v4 = vrot.slane %v1072_v20, 4 }
  0x36   :  { %v817_v17 = vpack.c.bf16 %v425_v12, %v423_v10  ;;  %v387_v56 = vld [vmem:[#allocation6 + $0x120] sm:$0xff]  ;;  %v389_v57 = vld [vmem:[#allocation6 + $0x130] sm:$0xff]  ;;  %v456_v10 = vld [vmem:[#allocation6 + $0x348] sm:$0xff] }
  0x37   :  { %v458_v12 = vld [vmem:[#allocation6 + $0x358] sm:$0xff] }
  0xb6   :  { %v72_v29 = vpop.xlane.xlu0 %71  ;;  %v60_v30 = vpop.xlane.xlu1 %59 }
  0xb7   :  { %v82_v31 = vmul.f32 0.00390625, %v72_v29  ;;  %v376_v29 = vld [vmem:[#allocation6 + $0xc8] sm:$0xff] }
  0xb9   :  { %v87_v35 = vsel %vm86_vm1, %v60_v30, %v82_v31  ;;  %v378_v30 = vld [vmem:[#allocation6 + $0xd8] sm:$0xff] }
  0xba   :  { %v75_v32 = vpop.xlane.xlu0 %74  ;;  %v63_v33 = vpop.xlane.xlu1 %62 }
  0xbb   :  { %v83_v34 = vmul.f32 0.00390625, %v75_v32  ;;  %v767_v32 = vpack.c.bf16 %v378_v30, %v376_v29  ;;  %v431_v29 = vld [vmem:[#allocation6 + $0x280] sm:$0xff]  ;;  %v433_v30 = vld [vmem:[#allocation6 + $0x290] sm:$0xff] }
  0xbd   :  { %v88_v36 = vsel %vm86_vm1, %v63_v33, %v83_v34  ;;  %v375_v33 = vld [vmem:[#allocation6 + $0xc0] sm:$0xff]  ;;  %v377_v34 = vld [vmem:[#allocation6 + $0xd0] sm:$0xff] }
  0xbe   :  { %v78_v37 = vpop.xlane.xlu0 %77  ;;  %v81_v38 = vpop.xlane.xlu1 %80  ;;  %v738_v39 = vpack.c.bf16 %v88_v36, %v87_v35  ;;  %v380_v35 = vld [vmem:[#allocation6 + $0xe8] sm:$0xff]  ;;  %v382_v36 = vld [vmem:[#allocation6 + $0xf8] sm:$0xff] }
  0xbf   :  { %v84_v40 = vmul.f32 0.00390625, %v78_v37  ;;  %v85_v41 = vmul.f32 0.00390625, %v81_v38  ;;  %v769_v37 = vpack.c.bf16 %v377_v34, %v375_v33  ;;  %v771_v38 = vpack.c.bf16 %v382_v36, %v380_v35  ;;  %v435_v35 = vld [vmem:[#allocation6 + $0x2a0] sm:$0xff]  ;;  %v437_v36 = vld [vmem:[#allocation6 + $0x2b0] sm:$0xff] }
  0xc0   :  { %739 = vmatpush3.bf16.msra.mxu0 %v738_v39  ;;  %v379_v39 = vld [vmem:[#allocation6 + $0xe0] sm:$0xff]  ;;  %v825_v33 = vpack.c.bf16 %v433_v30, %v431_v29  ;;  %v460_v30 = vld [vmem:[#allocation6 + $0x368] sm:$0xff] }
  0xc1   :  { %740 = vmatprep.subr.bf16.mxu0 %v987_v27  ;;  %v371_v27 = vld [vmem:[#allocation6 + $0xa0] sm:$0xff] }
  0xc2   :  { %v66_v42 = vpop.xlane.xlu0 %65  ;;  %v69_v43 = vpop.xlane.xlu1 %68  ;;  %v765_v31 = vpack.c.bf16 %v373_v28, %v371_v27  ;;  %v821_v27 = vpack.c.bf16 %v429_v24, %v427_v23  ;;  %v396_v23 = vld [vmem:[#allocation6 + $0x168] sm:$0xff]  ;;  %v398_v24 = vld [vmem:[#allocation6 + $0x178] sm:$0xff] }
  0xc3   :  { %v89_v44 = vsel %vm86_vm1, %v66_v42, %v84_v40  ;;  %v90_v45 = vsel %vm86_vm1, %v69_v43, %v85_v41  ;;  %v381_v40 = vld [vmem:[#allocation6 + $0xf0] sm:$0xff]  ;;  %v384_v41 = vld [vmem:[#allocation6 + $0x108] sm:$0xff]  ;;  %v386_v42 = vld [vmem:[#allocation6 + $0x118] sm:$0xff] }
  0xc4   :  { %v741_v46 = vpack.c.bf16 %v90_v45, %v89_v44  ;;  %v773_v43 = vpack.c.bf16 %v381_v40, %v379_v39  ;;  %v775_v44 = vpack.c.bf16 %v386_v42, %v384_v41  ;;  %v383_v45 = vld [vmem:[#allocation6 + $0x100] sm:$0xff]  ;;  %v829_v39 = vpack.c.bf16 %v437_v36, %v435_v35  ;;  %v441_v42 = vld [vmem:[#allocation6 + $0x2d0] sm:$0xff]  ;;  %v400_v36 = vld [vmem:[#allocation6 + $0x188] sm:$0xff] }
  0xc5   :  { %v439_v41 = vld [vmem:[#allocation6 + $0x2c0] sm:$0xff] }
  0xc6   :  { %742 = vmatpush3.bf16.msra.mxu0 %v741_v46  ;;  %v385_v46 = vld [vmem:[#allocation6 + $0x110] sm:$0xff] }
  0xc7   :  { %744 = vmatprep.subr.bf16.mxu0 %v743_v52  ;;  %v777_v49 = vpack.c.bf16 %v385_v46, %v383_v45  ;;  %v418_v52 = vld [vmem:[#allocation6 + $0x218] sm:$0xff]  ;;  %v833_v45 = vpack.c.bf16 %v441_v42, %v439_v41  ;;  %v464_v42 = vld [vmem:[#allocation6 + $0x388] sm:$0xff] }
  0xc9   :  { %727 = vmatmul.mubr.msk.f32.vlgmr.msra.gmra.mrb[0].mxu0 %vm92_vm2, %v91_v47  ;;  %v388_v47 = vld [vmem:[#allocation6 + $0x128] sm:$0xff] }
  0xca   :  { %746 = vmatpush1.bf16.msra.mxu0 %v745_v54  ;;  %v779_v50 = vpack.c.bf16 %v390_v48, %v388_v47  ;;  %v417_v54 = vld [vmem:[#allocation6 + $0x210] sm:$0xff]  ;;  %v443_v47 = vld [vmem:[#allocation6 + $0x2e0] sm:$0xff] }
  0xcb   :  { %748 = vmatprep.subr.bf16.mxu0 %v747_v59  ;;  %v809_v62 = vpack.c.bf16 %v417_v54, %v415_v53  ;;  %v445_v48 = vld [vmem:[#allocation6 + $0x2f0] sm:$0xff]  ;;  %v447_v53 = vld [vmem:[#allocation6 + $0x300] sm:$0xff] }
  0xcc   :  { %v449_v54 = vld [vmem:[#allocation6 + $0x310] sm:$0xff] }
  0xce   :  { %750 = vmatpush1.bf16.msra.mxu0 %v749_v60  ;;  %v807_v60 = vpack.c.bf16 %v418_v52, %v416_v51  ;;  %v837_v51 = vpack.c.bf16 %v445_v48, %v443_v47  ;;  %v343_v47 = vrot.slane %v1077_v22, 4 }
  0xcf   :  { %752 = vmatprep.subr.bf16.mxu0 %v751_v63  ;;  %v169_v63 = vld [vmem:[%s1138_s2 + $0x10] sm:$0xff] }
  0xd2   :  { %754 = vmatpush1.bf16.msra.mxu0 %v753_v3  ;;  %v421_v3 = vld [vmem:[#allocation6 + $0x230] sm:$0xff] }
  0xd3   :  { %756 = vmatprep.subr.bf16.mxu0 %v755_v7  ;;  %v170_v7 = vld [vmem:[%s1138_s2 + $0x18] sm:$0xff]  ;;  %v813_v8 = vpack.c.bf16 %v421_v3, %v419_v2  ;;  %v392_v2 = vld [vmem:[#allocation6 + $0x148] sm:$0xff]  ;;  %s990_s2 = smov 127  }
  0xd4   :  { %v394_v3 = vld [vmem:[#allocation6 + $0x158] sm:$0xff] }
  0xd5   :  { %v783_v6 = vpack.c.bf16 %v394_v3, %v392_v2 }
  0xd6   :  { %758 = vmatpush1.bf16.msra.mxu0 %v757_v14  ;;  %v428_v14 = vld [vmem:[#allocation6 + $0x268] sm:$0xff] }
  0xd7   :  { %760 = vmatprep.subr.bf16.mxu0 %v759_v15  ;;  %v430_v15 = vld [vmem:[#allocation6 + $0x278] sm:$0xff] }
  0xd8   :  { %v819_v18 = vpack.c.bf16 %v430_v15, %v428_v14  ;;  %v847_v14 = vpack.c.bf16 %v458_v12, %v456_v10  ;;  %v455_v15 = vld [vmem:[#allocation6 + $0x340] sm:$0xff]  ;;  %v412_v12 = vld [vmem:[#allocation6 + $0x1e8] sm:$0xff] }
  0xd9   :  { %v471_v10 = vld [vmem:[#allocation6 + $0x3c0] sm:$0xff] }
  0xda   :  { %762 = vmatpush1.bf16.msra.mxu0 %v761_v25  ;;  %v432_v25 = vld [vmem:[#allocation6 + $0x288] sm:$0xff] }
  0xdb   :  { %764 = vmatprep.subr.bf16.mxu0 %v763_v26  ;;  %v434_v26 = vld [vmem:[#allocation6 + $0x298] sm:$0xff] }
  0xdc   :  { %v823_v28 = vpack.c.bf16 %v434_v26, %v432_v25  ;;  %v335_v25 = vadd.f32 %v334_v4, %v1072_v20  ;;  %v787_v26 = vpack.c.bf16 %v398_v24, %v396_v23  ;;  %v399_v20 = vld [vmem:[#allocation6 + $0x180] sm:$0xff]  ;;  %v409_v4 = vld [vmem:[#allocation6 + $0x1d0] sm:$0xff] }
  0xdd   :  { %v413_v23 = vld [vmem:[#allocation6 + $0x1f0] sm:$0xff] }
  0xde   :  { %766 = vmatpush1.bf16.msra.mxu0 %v765_v31  ;;  %v436_v31 = vld [vmem:[#allocation6 + $0x2a8] sm:$0xff] }
  0xdf   :  { %768 = vmatprep.subr.bf16.mxu0 %v767_v32  ;;  %v438_v32 = vld [vmem:[#allocation6 + $0x2b8] sm:$0xff] }
  0xe0   :  { %v827_v34 = vpack.c.bf16 %v438_v32, %v436_v31  ;;  %v462_v31 = vld [vmem:[#allocation6 + $0x378] sm:$0xff]  ;;  %v459_v32 = vld [vmem:[#allocation6 + $0x360] sm:$0xff] }
  0xe2   :  { %770 = vmatpush1.bf16.msra.mxu0 %v769_v37  ;;  %v440_v37 = vld [vmem:[#allocation6 + $0x2c8] sm:$0xff] }
  0xe3   :  { %772 = vmatprep.subr.bf16.mxu0 %v771_v38  ;;  %v442_v38 = vld [vmem:[#allocation6 + $0x2d8] sm:$0xff] }
  0xe4   :  { %v831_v40 = vpack.c.bf16 %v442_v38, %v440_v37  ;;  %v402_v37 = vld [vmem:[#allocation6 + $0x198] sm:$0xff]  ;;  %v336_v38 = vrot.slane %v335_v25, 2 }
  0xe6   :  { %774 = vmatpush1.bf16.msra.mxu0 %v773_v43  ;;  %v444_v43 = vld [vmem:[#allocation6 + $0x2e8] sm:$0xff]  ;;  %v337_v1 = vadd.f32 %v336_v38, %v335_v25 }
  0xe7   :  { %776 = vmatprep.subr.bf16.mxu0 %v775_v44  ;;  %v446_v44 = vld [vmem:[#allocation6 + $0x2f8] sm:$0xff] }
  0xe8   :  { %v835_v46 = vpack.c.bf16 %v446_v44, %v444_v43  ;;  %v466_v43 = vld [vmem:[#allocation6 + $0x398] sm:$0xff]  ;;  %v463_v44 = vld [vmem:[#allocation6 + $0x380] sm:$0xff]  ;;  %v338_v25 = vrot.slane %v337_v1, 1 }
  0xe9   :  { %v855_v48 = vpack.c.bf16 %v466_v43, %v464_v42 }
  0xea   :  { %778 = vmatpush1.bf16.msra.mxu0 %v777_v49  ;;  %v448_v49 = vld [vmem:[#allocation6 + $0x308] sm:$0xff] }
  0xeb   :  { %780 = vmatprep.subr.bf16.mxu0 %v779_v50  ;;  %v450_v50 = vld [vmem:[#allocation6 + $0x318] sm:$0xff] }
  0xec   :  { %v839_v52 = vpack.c.bf16 %v450_v50, %v448_v49  ;;  %v465_v49 = vld [vmem:[#allocation6 + $0x390] sm:$0xff]  ;;  %v404_v50 = vld [vmem:[#allocation6 + $0x1a8] sm:$0xff] }
 0x19c   :  { %v162_v55 = vpop.f32.mrb[0].mxu0 }
 0x19d   :  { %v166_v58 = vmax.f32 %v162_v55, 0.0  ;;  %v728_v59 = vpop.f32.mrb[1].mxu0  ;;  %v841_v55 = vpack.c.bf16 %v449_v54, %v447_v53  ;;  %v403_v54 = vld [vmem:[#allocation6 + $0x1a0] sm:$0xff] }
 0x19e   :  { %v452_v59 = vld [vmem:[#allocation6 + $0x328] sm:$0xff] }
 0x19f   :  { %729 = vmatprep.subr.mxu1 %v166_v58 }
 0x1a0   :  { %730 = vmatpush3.msra.mxu1 %v166_v58  ;;  %v781_v58 = vpack.c.bf16 %v389_v57, %v387_v56  ;;  %v468_v56 = vld [vmem:[#allocation6 + $0x3a8] sm:$0xff]  ;;  %v469_v57 = vld [vmem:[#allocation6 + $0x3b0] sm:$0xff] }
 0x1a1   :  { %732 = vmatmul.mubr.msk.f32.vlgmr.msra.gmra.mrb[0].mxu1 %vm171_vm3, %v168_v61  ;;  %808 = vmatprep.subr.bf16.mxu1 %v807_v60  ;;  %v454_v60 = vld [vmem:[#allocation6 + $0x338] sm:$0xff] }
 0x1a2   :  { %734 = vmatprep.mubr.msk.f32.mxu1 %vm171_vm3, %v169_v63  ;;  %810 = vmatpush1.bf16.msra.mxu1 %v809_v62  ;;  %v843_v61 = vpack.c.bf16 %v454_v60, %v452_v59  ;;  %v451_v62 = vld [vmem:[#allocation6 + $0x320] sm:$0xff]  ;;  %v453_v63 = vld [vmem:[#allocation6 + $0x330] sm:$0xff] }
 0x1a3   :  { %812 = vmatprep.subr.bf16.mxu1 %v811_v0  ;;  %782 = vmatpush1.bf16.msra.mxu0 %v781_v58  ;;  %v845_v0 = vpack.c.bf16 %v453_v63, %v451_v62  ;;  %v344_v58 = vadd.f32 %v343_v47, %v1077_v22  ;;  %v410_v62 = vld [vmem:[#allocation6 + $0x1d8] sm:$0xff]  ;;  %v407_v63 = vld [vmem:[#allocation6 + $0x1c0] sm:$0xff]  ;;  %v473_v22 = vld [vmem:[#allocation6 + $0x3d0] sm:$0xff] }
 0x1a4   :  { %784 = vmatprep.subr.bf16.mxu0 %v783_v6  ;;  %v474_v6 = vld [vmem:[#allocation6 + $0x3d8] sm:$0xff] }
 0x1a5   :  { %735 = vmatmul.mubr.msk.f32.gmra.mrb[2].mxu1 %vm171_vm3, %v170_v7  ;;  %v391_v7 = vld [vmem:[#allocation6 + $0x140] sm:$0xff] }
 0x1a6   :  { %814 = vmatpush1.bf16.msra.mxu1 %v813_v8  ;;  %v393_v8 = vld [vmem:[#allocation6 + $0x150] sm:$0xff] }
 0x1a7   :  { %816 = vmatprep.subr.bf16.mxu1 %v815_v9  ;;  %v785_v9 = vpack.c.bf16 %v393_v8, %v391_v7  ;;  %v345_v7 = vrot.slane %v344_v58, 2  ;;  %v801_v8 = vpack.c.bf16 %v409_v4, %v407_v63 }
 0x1a9   :  { %786 = vmatpush1.bf16.msra.mxu0 %v785_v9  ;;  %v346_v24 = vadd.f32 %v345_v7, %v344_v58 }
 0x1aa   :  { %818 = vmatpush1.bf16.msra.mxu1 %v817_v17  ;;  %v457_v17 = vld [vmem:[#allocation6 + $0x350] sm:$0xff]  ;;  %788 = vmatprep.subr.bf16.mxu0 %v787_v26  ;;  %v865_v26 = vpack.c.bf16 %v473_v22, %v471_v10 }
 0x1ab   :  { %820 = vmatprep.subr.bf16.mxu1 %v819_v18  ;;  %v849_v18 = vpack.c.bf16 %v457_v17, %v455_v15  ;;  %v414_v17 = vld [vmem:[#allocation6 + $0x1f8] sm:$0xff] }
 0x1ae   :  { %822 = vmatpush1.bf16.msra.mxu1 %v821_v27  ;;  %v395_v27 = vld [vmem:[#allocation6 + $0x160] sm:$0xff] }
 0x1af   :  { %824 = vmatprep.subr.bf16.mxu1 %v823_v28  ;;  %v397_v28 = vld [vmem:[#allocation6 + $0x170] sm:$0xff] }
 0x1b0   :  { %v789_v29 = vpack.c.bf16 %v397_v28, %v395_v27  ;;  %v803_v27 = vpack.c.bf16 %v414_v17, %v412_v12  ;;  %v476_v28 = vld [vmem:[#allocation6 + $0x3e8] sm:$0xff] }
 0x1b2   :  { %826 = vmatpush1.bf16.msra.mxu1 %v825_v33  ;;  %v851_v33 = vpack.c.bf16 %v462_v31, %v460_v30  ;;  %790 = vmatpush1.bf16.msra.mxu0 %v789_v29  ;;  %v478_v29 = vld [vmem:[#allocation6 + $0x3f8] sm:$0xff] }
 0x1b3   :  { %828 = vmatprep.subr.bf16.mxu1 %v827_v34  ;;  %v461_v34 = vld [vmem:[#allocation6 + $0x370] sm:$0xff]  ;;  %v867_v31 = vpack.c.bf16 %v478_v29, %v476_v28 }
 0x1b4   :  { %v853_v35 = vpack.c.bf16 %v461_v34, %v459_v32  ;;  %v475_v32 = vld [vmem:[#allocation6 + $0x3e0] sm:$0xff] }
 0x1b6   :  { %830 = vmatpush1.bf16.msra.mxu1 %v829_v39  ;;  %v791_v39 = vpack.c.bf16 %v402_v37, %v400_v36 }
 0x1b7   :  { %832 = vmatprep.subr.bf16.mxu1 %v831_v40  ;;  %v401_v40 = vld [vmem:[#allocation6 + $0x190] sm:$0xff] }
 0x1b8   :  { %v793_v41 = vpack.c.bf16 %v401_v40, %v399_v20  ;;  %792 = vmatprep.subr.bf16.mxu0 %v791_v39  ;;  %v339_v39 = vadd.f32 %v338_v25, %v337_v1  ;;  %v655_v25 = vlaneseq }
 0x1ba   :  { %834 = vmatpush1.bf16.msra.mxu1 %v833_v45  ;;  %v324_v45 = vmax.f32 %v322_v13, %v323_v19  ;;  %794 = vmatpush1.bf16.msra.mxu0 %v793_v41  ;;  %v470_v13 = vld [vmem:[#allocation6 + $0x3b8] sm:$0xff]  ;;  %v467_v19 = vld [vmem:[#allocation6 + $0x3a0] sm:$0xff]  ;;  %v349_v43 = vmul.f32 0.03125, %v339_v39 }
 0x1bb   :  { %836 = vmatprep.subr.bf16.mxu1 %v835_v46  ;;  %v316_v46 = vrot.slane %v1074_v21, 4  ;;  %v859_v59 = vpack.c.bf16 %v470_v13, %v468_v56  ;;  %v861_v60 = vpack.c.bf16 %v469_v57, %v467_v19 }
 0x1bc   :  { %v325_v5 = vrot.slane %v324_v45, 4 }
 0x1bd   :  { %v317_v16 = vmax.f32 %v1074_v21, %v316_v46  ;;  %v472_v21 = vld [vmem:[#allocation6 + $0x3c8] sm:$0xff] }
 0x1be   :  { %838 = vmatpush1.bf16.msra.mxu1 %v837_v51  ;;  %v406_v51 = vld [vmem:[#allocation6 + $0x1b8] sm:$0xff]  ;;  %v863_v9 = vpack.c.bf16 %v474_v6, %v472_v21 }
 0x1bf   :  { %840 = vmatprep.subr.bf16.mxu1 %v839_v52  ;;  %v857_v52 = vpack.c.bf16 %v465_v49, %v463_v44  ;;  %v795_v53 = vpack.c.bf16 %v406_v51, %v404_v50  ;;  %v318_v2 = vrot.slane %v317_v16, 2  ;;  %v480_v49 = vstv %s1140_s4  ;;  %s992_s4 = smov [#allocation8]  }
 0x1c0   :  { %s684_s30 = sshll.u32 %s992_s4, 4  ;;  %s685_s30 = int_to_ptr.vmem [resolvable:$true] %s684_s30 }
 0x1c1   :  { %796 = vmatprep.subr.bf16.mxu0 %v795_v53  ;;  %v319_v15 = vmax.f32 %v317_v16, %v318_v2  ;;  %s955_s6 = scalar_lea.vmem %s685_s30, 1024  ;;  %p960_p3 = scmp.lt.s32.totalorder %s685_s30, %s685_s30 }
 0x1c2   :  { %842 = vmatpush1.bf16.msra.mxu1 %v841_v55  ;;  %v405_v55 = vld [vmem:[#allocation6 + $0x1b0] sm:$0xff]  ;;  %p956_p2 = scmp.ne.s32.totalorder %s685_s30, %s955_s6  ;;  %p961_p4 = scmp.lt.s32.totalorder %s955_s6, %s955_s6 }
 0x1c3   :  { %844 = vmatprep.subr.bf16.mxu1 %v843_v61  ;;  %v797_v11 = vpack.c.bf16 %v405_v55, %v403_v54  ;;  %v408_v61 = vld [vmem:[#allocation6 + $0x1c8] sm:$0xff]  ;;  %v320_v34 = vrot.slane %v319_v15, 1 }
 0x1c4   :  { %v799_v3 = vpack.c.bf16 %v410_v62, %v408_v61  ;;  %p962_p5 = por %p961_p4, %p960_p3 }
 0x1c5   :  { %798 = vmatpush1.bf16.msra.mxu0 %v797_v11  ;;  %v321_v41 = vmax.f32 %v319_v15, %v320_v34 }
 0x1c6   :  { %846 = vmatpush1.bf16.msra.mxu1 %v845_v0  ;;  %v326_v0 = vmax.f32 %v324_v45, %v325_v5  ;;  %800 = vmatprep.subr.bf16.mxu0 %v799_v3  ;;  %p963_p6 = pnand %p962_p5, %p956_p2 }
 0x1c7   :  { %848 = vmatprep.subr.bf16.mxu1 %v847_v14 }
 0x1c8   :  { %v327_v14 = vrot.slane %v326_v0, 2 }
 0x1c9   :  { %802 = vmatpush1.bf16.msra.mxu0 %v801_v8 }
 0x1ca   :  { %850 = vmatpush1.bf16.msra.mxu1 %v849_v18  ;;  %v411_v18 = vld [vmem:[#allocation6 + $0x1e0] sm:$0xff]  ;;  %v328_v30 = vmax.f32 %v326_v0, %v327_v14  ;;  %804 = vmatprep.subr.bf16.mxu0 %v803_v27 }
 0x1cb   :  { %852 = vmatprep.subr.bf16.mxu1 %v851_v33  ;;  %v477_v33 = vld [vmem:[#allocation6 + $0x3f0] sm:$0xff]  ;;  %v805_v36 = vpack.c.bf16 %v413_v23, %v411_v18 }
 0x1cc   :  { %v329_v37 = vrot.slane %v328_v30, 1  ;;  %v869_v40 = vpack.c.bf16 %v477_v33, %v475_v32 }
 0x1cd   :  { %806 = vmatpush1.bf16.msra.mxu0 %v805_v36 }
 0x1ce   :  { %854 = vmatpush1.bf16.msra.mxu1 %v853_v35  ;;  %v347_v35 = vrot.slane %v346_v24, 1  ;;  %v330_v20 = vmax.f32 %v328_v30, %v329_v37 }
 0x1cf   :  { %856 = vmatprep.subr.bf16.mxu1 %v855_v48  ;;  %v991_v48 = vmov 0  }
 0x1d0   :  { %v348_v38 = vadd.f32 %v347_v35, %v346_v24  ;;  %545 = vmatprep.mubr.f32.mxu0 %v330_v20  ;;  %885 = vset.pattern.permute.xlu1 %v991_v48 }
 0x1d1   :  { %546 = vmatmul.mubr.f32.vlgmr.msra.gmra.mrb[2].mxu0 %v321_v41  ;;  %886 = vset.pattern.permute.xlu0 %v991_v48 }
 0x1d2   :  { %858 = vmatpush1.bf16.msra.mxu1 %v857_v52  ;;  %v350_v42 = vmul.f32 0.03125, %v348_v38 }
 0x1d3   :  { %860 = vmatprep.subr.bf16.mxu1 %v859_v59 }
 0x1d4   :  { %616 = vmatprep.mubr.f32.mxu1 %v350_v42 }
 0x1d6   :  { %862 = vmatpush1.bf16.msra.mxu1 %v861_v60 }
 0x1d7   :  { %864 = vmatprep.subr.bf16.mxu1 %v863_v9 }
 0x1da   :  { %866 = vmatpush1.bf16.msra.mxu1 %v865_v26  ;;  %v656_v26 = vshrl.u32 %v655_v25, 7 }
 0x1db   :  { %868 = vmatprep.subr.bf16.mxu1 %v867_v31 }
 0x1dc   :  { %v657_v28 = vsub.s32 0, %v656_v26 }
 0x1de   :  { %870 = vmatpush1.bf16.msra.mxu1 %v869_v40 }
 0x1e1   :  { %617 = vmatmul.mubr.f32.vlgmr.msra.gmra.mrb[4].mxu1 %v349_v43 }
 0x274   :  { %v733_v44 = vpop.f32.mrb[0].mxu1 }
 0x275   :  { %275 = vrot.lane.b32.xlu1 %v733_v44, %s990_s2  ;;  %v250_v45 = vpop.f32.mrb[1].mxu1 }
 0x276   :  { %273 = vrot.lane.b32.xlu0 %v250_v45, %s990_s2 }
 0x278   :  { %v736_v46 = vpop.f32.mrb[2].mxu1 }
 0x279   :  { %v260_v47 = vpop.f32.mrb[3].mxu1 }
 0x27a   :  { %277 = vrot.lane.b32.xlu1 %v260_v47, %s990_s2 }
 0x27e   :  { %279 = vrot.lane.b32.xlu1 %v736_v46, %s990_s2 }
 0x2a4   :  { %v547_v50 = vpop.f32.mrb[2].mxu0 }
 0x2a5   :  { %v548_v51 = vadd.f32 %v547_v50, %v480_v49  ;;  %v549_v52 = vpop.f32.mrb[3].mxu0 }
 0x2a6   :  { %v550_v53 = vadd.f32 %v549_v52, %v480_v49 }
 0x2b4   :  { %v618_v54 = vpop.f32.mrb[4].mxu1 }
 0x2b5   :  { %v619_v55 = vadd.f32 %v618_v54, %v548_v51  ;;  %v620_v56 = vpop.f32.mrb[5].mxu1 }
 0x2b6   :  { %v621_v5 = vadd.f32 %v620_v56, %v550_v53 }
 0x2b7   :  { %v706_v14 = vmul.f32 -1.442695, %v619_v55 }
 0x2b8   :  { %v707_v15 = vmul.f32 -1.442695, %v621_v5 }
 0x2e7   :  { %v276_v16 = vpop.permute.xlu1 %275 }
 0x2e8   :  { %v286_v1 = vadd.f32 %v733_v44, %v276_v16  ;;  %v274_v11 = vpop.permute.xlu0 %273 }
 0x2e9   :  { %v285_v13 = vadd.f32 %v274_v11, %v250_v45 }
 0x2ea   :  { %v703_v19 = vmul.f32 -1.442695, %v286_v1 }
 0x2eb   :  { %v702_v57 = vmul.f32 -1.442695, %v285_v13 }
 0x2ec   :  { %887 = vpow2.f32 %v703_v19  ;;  %v278_v58 = vpop.permute.xlu1 %277 }
 0x2ed   :  { %889 = vpow2.f32 %v702_v57  ;;  %v287_v59 = vadd.f32 %v278_v58, %v260_v47 }
 0x2ef   :  { %v704_v60 = vmul.f32 -1.442695, %v287_v59 }
 0x2f0   :  { %v280_v61 = vpop.permute.xlu1 %279 }
 0x2f1   :  { %891 = vpow2.f32 %v704_v60  ;;  %v288_v62 = vadd.f32 %v736_v46, %v280_v61 }
 0x2f3   :  { %v705_v63 = vmul.f32 -1.442695, %v288_v62 }
 0x2f5   :  { %893 = vpow2.f32 %v705_v63 }
 0x2f6   :  { %v888_v0 = vpop.eup %887 }
 0x2f7   :  { %v890_v2 = vpop.eup %889  ;;  %v302_v3 = vadd.f32 1.0, %v888_v0 }
 0x2f8   :  { %v301_v4 = vadd.f32 1.0, %v890_v2 }
 0x2f9   :  { %895 = vrcp.f32 %v302_v3 }
 0x2fa   :  { %897 = vrcp.f32 %v301_v4 }
 0x2fb   :  { %v892_v21 = vpop.eup %891 }
 0x2fc   :  { %v303_v6 = vadd.f32 1.0, %v892_v21 }
 0x2fe   :  { %899 = vrcp.f32 %v303_v6 }
 0x2ff   :  { %v894_v7 = vpop.eup %893 }
 0x300   :  { %v304_v8 = vadd.f32 1.0, %v894_v7 }
 0x302   :  { %901 = vrcp.f32 %v304_v8 }
 0x303   :  { %v896_v9 = vpop.eup %895  ;;  %903 = vpow2.f32 %v706_v14 }
 0x304   :  { %v898_v10 = vpop.eup %897  ;;  %642 = vperm.xlu1 %885, %v896_v9   ;;  %905 = vpow2.f32 %v707_v15 }
 0x305   :  { %637 = vperm.xlu0 %886, %v898_v10  }
 0x308   :  { %v900_v22 = vpop.eup %899 }
 0x309   :  { %647 = vperm.xlu1 %885, %v900_v22  }
 0x30c   :  { %v902_v12 = vpop.eup %901 }
 0x30d   :  { %652 = vperm.xlu0 %886, %v902_v12   ;;  %v904_v17 = vpop.eup %903 }
 0x30e   :  { %v906_v18 = vpop.eup %905  ;;  %v629_v23 = vadd.f32 1.0, %v904_v17 }
 0x30f   :  { %v630_v24 = vadd.f32 1.0, %v906_v18 }
 0x310   :  { %907 = vrcp.f32 %v629_v23 }
 0x311   :  { %909 = vrcp.f32 %v630_v24 }
 0x31a   :  { %v908_v27 = vpop.eup %907 }
 0x31b   :  { %v910_v29 = vpop.eup %909  ;;  %v658_v30 = vrot.slane %v908_v27, %v657_v28 }
 0x31c   :  { %v662_v31 = vrot.slane %v910_v29, %v657_v28 }
 0x383   :  { %v643_v32 = vpop.permute.xlu1 %642 }
 0x384   :  { %v665_v33 = vmul.f32 %v658_v30, %v643_v32  ;;  %v666_v34 = vmul.f32 %v662_v31, %v643_v32  ;;  %v638_v35 = vpop.permute.xlu0 %637 }
 0x385   :  { %v663_v36 = vmul.f32 %v658_v30, %v638_v35  ;;  %v664_v37 = vmul.f32 %v662_v31, %v638_v35 }
 0x386   :  { %673 = vst [vmem:[#allocation8 + $0x10] sm:$0xff] %v665_v33  ;;  %674 = vst [vmem:[#allocation8 + $0x18] sm:$0xff] %v666_v34 }
 0x387   :  { %671 = vst [vmem:[#allocation8] sm:$0xff] %v663_v36  ;;  %672 = vst [vmem:[#allocation8 + $0x8] sm:$0xff] %v664_v37 }
 0x388   :  { %v648_v38 = vpop.permute.xlu1 %647 }
 0x389   :  { %v667_v39 = vmul.f32 %v658_v30, %v648_v38  ;;  %v668_v20 = vmul.f32 %v662_v31, %v648_v38 }
 0x38b   :  { %675 = vst [vmem:[#allocation8 + $0x20] sm:$0xff] %v667_v39  ;;  %676 = vst [vmem:[#allocation8 + $0x28] sm:$0xff] %v668_v20 }
 0x38c   :  { %v653_v40 = vpop.permute.xlu0 %652 }
 0x38d   :  { %v669_v41 = vmul.f32 %v658_v30, %v653_v40  ;;  %v670_v42 = vmul.f32 %v662_v31, %v653_v40 }
 0x38f   :  { %677 = vst [vmem:[#allocation8 + $0x30] sm:$0xff] %v669_v41  ;;  %678 = vst [vmem:[#allocation8 + $0x38] sm:$0xff] %v670_v42 }
 0x390   :  { %966 = shalt.err (!%p963_p6)
}
 0x391   :  { %s967_s9 = scalar_lea.hbm %s1141_s5, 1024 }
 0x392   :  { %p968_p7 = scmp.ne.s32.totalorder %s1141_s5, %s967_s9  ;;  %p971_p8 = scmp.lt.u32.totalorder %s967_s9, %s1141_s5 }
 0x394   :  { %p973_p9 = pnand %p971_p8, %p968_p7 }
 0x396   :  { %976 = shalt.err (!%p973_p9)
}
 0x397   :  { %690 = dma.vmem_to_hbm [thread:$0]  %s685_s30, 1024, %s1141_s5, [#allocation5], %s984_s28, %s984_s28, %s985_s29  }
 0x398   :  { %981 = dma.done.wait [#allocation5], 1024  }
 0x399   :  { %982 = vsyncadd [#allocation5], 4294966272 }
 0x39a   :  { %694 = vsyncpa [#allocation4], 1 }
 0x39b   :  { %695 = vsyncpa [#allocation7], 1 }
 0x39c   :  { %696 = vsyncpa [#allocation5], 1 }

</bundles_post_ra>
